<compile_context>
chip_gen: v7x
topology: tpu7x:2x2x1
jax: 0.10.0
libtpu: 0.0.40
codegen_flags: <defaults>
</compile_context>

<pallas_src>
import math
import functools

import jax
import jax.numpy as jnp
from jax.experimental import pallas as pl
from jax.experimental.pallas import tpu as pltpu


def _gc_kernel(x_ref, wbd_ref, akron_ref, bias_ref, out_ref):
    f32 = jnp.float32
    # (1) feature matmul against block-diagonal weights: (B, N*F) @ (N*F, N*O)
    z = jnp.dot(x_ref[...], wbd_ref[...], preferred_element_type=f32)
    # (2) graph mixing on the flattened (node-major, output-fastest) layout:
    #     (B, N*O) @ (N*O, N*O) with kron(A^T, I_O)
    y = jnp.dot(z, akron_ref[...], preferred_element_type=f32)
    # (3) one unmasked full-width store with the bias folded in
    out_ref[...] = (y + bias_ref[...]).astype(out_ref.dtype)


@functools.partial(jax.jit, static_argnames=("nodes", "in_size", "units", "output_size"))
def gc_forward(inputs, state, adj, weights, bias, *, nodes, in_size, units, output_size):
    B = inputs.shape[0]
    F = in_size + units
    NF = nodes * F
    NO = nodes * output_size
    f32 = jnp.float32

    # x_flat[b, n*F + f] == concat(inputs, state)[b, n, f]  (tiny wrapper-side concat)
    x_flat = jnp.concatenate(
        [inputs.reshape(B, nodes, in_size).astype(f32),
         state.reshape(B, nodes, units).astype(f32)],
        axis=-1).reshape(B, NF)

    # Structural operands (fixed for a given model; cheap at N=16):
    #   W_bd   = kron(I_N, W)     : (N*F, N*O) block-diagonal weight
    #   A_kron = kron(A^T, I_O)   : (N*O, N*O) graph mixing on the flattened layout
    # TODO(synk): storage grows as N^2*F*O / N^2*O^2 -- revisit (tile / keep factored)
    #             for large node counts.
    w_bd = jnp.kron(jnp.eye(nodes, dtype=f32), weights.astype(f32))
    a_kron = jnp.kron(adj.astype(f32).T, jnp.eye(output_size, dtype=f32))
    bias_t = jnp.tile(bias.astype(f32), nodes).reshape(1, NO)

    out = pl.pallas_call(
        _gc_kernel,
        out_shape=jax.ShapeDtypeStruct((B, NO), f32),
        grid_spec=pltpu.PrefetchScalarGridSpec(
            num_scalar_prefetch=0,
            grid=(1,),   # single fused step: all operands (<400 KiB) live in VMEM
            in_specs=[
                pl.BlockSpec((B, NF), lambda i: (0, 0)),     # x_flat
                pl.BlockSpec((NF, NO), lambda i: (0, 0)),    # kron(I_N, W)
                pl.BlockSpec((NO, NO), lambda i: (0, 0)),    # kron(A^T, I_O)
                pl.BlockSpec((1, NO), lambda i: (0, 0)),     # bias (tiled to layout)
            ],
            out_specs=pl.BlockSpec((B, NO), lambda i: (0, 0)),
        ),
        compiler_params=pltpu.CompilerParams(
            dimension_semantics=("arbitrary",),
            vmem_limit_bytes=16 << 20),
    )(x_flat, w_bd, a_kron, bias_t)

    return out   # (B, N*O), matching the module's return shape


def gc_reference(inputs, state, adj, weights, bias, *, nodes, in_size, units, output_size):
    B = inputs.shape[0]
    x_in = inputs.reshape(B, nodes, in_size)
    x_st = state.reshape(B, nodes, units)
    x_s = jnp.concatenate([x_in, x_st], axis=2)            # (B, N, F)
    ax = jnp.einsum('nm,bmf->bnf', adj, x_s)               # A @ x_s per batch
    y = jnp.einsum('bnf,fo->bno', ax, weights) + bias
    return y.reshape(B, nodes * output_size)


if __name__ == "__main__":
    # small shapes consistent with the module
    batch = 2
    nodes = 16
    in_size = 4
    units = 32
    output_size = 8
    F = in_size + units

    key = jax.random.PRNGKey(0)
    k_in, k_st, k_adj, k_w, k_b = jax.random.split(key, 5)

    inputs = jax.random.normal(k_in, (batch, nodes * in_size), dtype=jnp.float32)
    state = jax.random.normal(k_st, (batch, nodes * units), dtype=jnp.float32)

    # deterministic symmetric row-normalized adjacency (single matrix; the torch loop
    # `for m in self._adj` only keeps the result of the last one anyway)
    raw = jax.random.uniform(k_adj, (nodes, nodes), dtype=jnp.float32)
    raw = (raw + raw.T) * 0.5 + jnp.eye(nodes, dtype=jnp.float32)
    adj = raw / jnp.sum(raw, axis=1, keepdims=True)

    # parameter init matching torch: uniform(-stdv, stdv), stdv = 1/sqrt(output_size)
    stdv = 1.0 / math.sqrt(output_size)
    weights = jax.random.uniform(k_w, (F, output_size), dtype=jnp.float32,
                                 minval=-stdv, maxval=stdv)
    bias = jax.random.uniform(k_b, (output_size,), dtype=jnp.float32,
                              minval=-stdv, maxval=stdv)

    out = gc_forward(inputs, state, adj, weights, bias,
                     nodes=nodes, in_size=in_size, units=units,
                     output_size=output_size)
    out = jax.block_until_ready(out)

    ref = gc_reference(inputs, state, adj, weights, bias,
                       nodes=nodes, in_size=in_size, units=units,
                       output_size=output_size)

    assert out.shape == (batch, nodes * output_size)
    # slightly looser tolerance: the kernel uses the reassociated A @ (Xs @ W) order
    assert jnp.allclose(out, ref, atol=1e-4, rtol=1e-4)
    print("KERNEL_OK")
</pallas_src>

<mosaic_0001>
module attributes {stable_mosaic.version = 11 : i64} {
  func.func @_gc_kernel(%arg0: i32, %arg1: memref<2x576xf32, #tpu.memory_space<vmem>>, %arg2: memref<576x128xf32, #tpu.memory_space<vmem>>, %arg3: memref<128x128xf32, #tpu.memory_space<vmem>>, %arg4: memref<1x128xf32, #tpu.memory_space<vmem>>, %arg5: memref<2x128xf32, #tpu.memory_space<vmem>>) attributes {dimension_semantics = [#tpu.dimension_semantics<arbitrary>], iteration_bounds = array<i64: 1>, scalar_prefetch = 0 : i64, scratch_operands = 0 : i64, tpu.core_type = #tpu.core_type<tc>, window_params = [{pipeline_mode = #tpu.pipeline_mode<synchronous>, transform_indices = @transform_0, window_bounds = array<i64: 2, 576>}, {pipeline_mode = #tpu.pipeline_mode<synchronous>, transform_indices = @transform_1, window_bounds = array<i64: 576, 128>}, {pipeline_mode = #tpu.pipeline_mode<synchronous>, transform_indices = @transform_2, window_bounds = array<i64: 128, 128>}, {pipeline_mode = #tpu.pipeline_mode<synchronous>, transform_indices = @transform_3, window_bounds = array<i64: 1, 128>}, {pipeline_mode = #tpu.pipeline_mode<synchronous>, transform_indices = @transform_4, window_bounds = array<i64: 2, 128>}]} {
    %c0 = arith.constant 0 : index
    %c0_0 = arith.constant 0 : index
    %0 = vector.load %arg1[%c0, %c0_0] : memref<2x576xf32, #tpu.memory_space<vmem>>, vector<2x576xf32>
    %c0_1 = arith.constant 0 : index
    %c0_2 = arith.constant 0 : index
    %1 = vector.load %arg2[%c0_1, %c0_2] : memref<576x128xf32, #tpu.memory_space<vmem>>, vector<576x128xf32>
    %cst = arith.constant dense<0.000000e+00> : vector<2x128xf32>
    %2 = tpu.matmul %0, %1, %cst {dimension_numbers = #tpu.dot_dimension_numbers<[1], [0], [0], [1], [0, 0, 1, 1], [], []>} : vector<2x576xf32>, vector<576x128xf32>, vector<2x128xf32> -> vector<2x128xf32>
    %c0_3 = arith.constant 0 : index
    %c0_4 = arith.constant 0 : index
    %3 = vector.load %arg3[%c0_3, %c0_4] : memref<128x128xf32, #tpu.memory_space<vmem>>, vector<128x128xf32>
    %cst_5 = arith.constant dense<0.000000e+00> : vector<2x128xf32>
    %4 = tpu.matmul %2, %3, %cst_5 {dimension_numbers = #tpu.dot_dimension_numbers<[1], [0], [0], [1], [0, 0, 1, 1], [], []>} : vector<2x128xf32>, vector<128x128xf32>, vector<2x128xf32> -> vector<2x128xf32>
    %c0_6 = arith.constant 0 : index
    %c0_7 = arith.constant 0 : index
    %5 = vector.load %arg4[%c0_6, %c0_7] : memref<1x128xf32, #tpu.memory_space<vmem>>, vector<1x128xf32>
    %6 = vector.broadcast %5 : vector<1x128xf32> to vector<2x128xf32>
    %7 = arith.addf %4, %6 : vector<2x128xf32>
    %c0_8 = arith.constant 0 : index
    %c0_9 = arith.constant 0 : index
    %8 = vector.load %arg5[%c0_8, %c0_9] : memref<2x128xf32, #tpu.memory_space<vmem>>, vector<2x128xf32>
    tpu.vector_store %arg5[%c0_8, %c0_9], %7 {strides = array<i32>} : memref<2x128xf32, #tpu.memory_space<vmem>>, vector<2x128xf32>,
    return
  }
  func.func @transform_0(%arg0: i32) -> (i32, i32) {
    %c0_i32 = arith.constant 0 : i32
    %c0_i32_0 = arith.constant 0 : i32
    %c0_i32_1 = arith.constant 0 : i32
    return %c0_i32, %c0_i32_0 : i32, i32
  }
  func.func @transform_1(%arg0: i32) -> (i32, i32) {
    %c0_i32 = arith.constant 0 : i32
    %c0_i32_0 = arith.constant 0 : i32
    %c0_i32_1 = arith.constant 0 : i32
    return %c0_i32, %c0_i32_0 : i32, i32
  }
  func.func @transform_2(%arg0: i32) -> (i32, i32) {
    %c0_i32 = arith.constant 0 : i32
    %c0_i32_0 = arith.constant 0 : i32
    %c0_i32_1 = arith.constant 0 : i32
    return %c0_i32, %c0_i32_0 : i32, i32
  }
  func.func @transform_3(%arg0: i32) -> (i32, i32) {
    %c0_i32 = arith.constant 0 : i32
    %c0_i32_0 = arith.constant 0 : i32
    %c0_i32_1 = arith.constant 0 : i32
    return %c0_i32, %c0_i32_0 : i32, i32
  }
  func.func @transform_4(%arg0: i32) -> (i32, i32) {
    %c0_i32 = arith.constant 0 : i32
    %c0_i32_0 = arith.constant 0 : i32
    %c0_i32_1 = arith.constant 0 : i32
    return %c0_i32, %c0_i32_0 : i32, i32
  }
}

</mosaic_0001>

<bundles_post_ra>
// kernel: tile.8
= control target key start
LH: loop header
LB: loop body
LE: loop exit
PB: predicated region body
PF: predicated region fallthrough
CT: control target
= control target key end

     0   :  { %s28_s0 = inlined_call_operand.vmem [shape: f32[8], index: 0, kind: input, shape index: {}]   ;;  %s29_s1 = inlined_call_operand.vmem [shape: f32[16,8], index: 1, kind: output, shape index: {}]  }
   0x1   :  { %v4_v0 = vld [vmem:[%s28_s0] ss:$0 sm:$0xff] }
   0x2   :  { %5 = vst [vmem:[%s29_s1] sm:$0xff] %v4_v0  ;;  %8 = vst [vmem:[%s29_s1 + $0x8] sm:$0xff] %v4_v0 }

// kernel: tile.9
= control target key start
LH: loop header
LB: loop body
LE: loop exit
PB: predicated region body
PF: predicated region fallthrough
CT: control target
= control target key end

     0   :  { %s131_s10 = smov 120   ;;  %s132_s11 = smov 104   ;;  %vm3_vm0 = vcmask 64512   ;;  %vm9_vm1 = vcmask 1048512   ;;  %vm15_vm2 = vcmask 982912   ;;  %vm21_vm3 = vcmask 917312   ;;  %s207_s0 = inlined_call_operand.vmem [shape: f32[16,8], index: 0, kind: input, shape index: {}]   ;;  %s208_s1 = inlined_call_operand.vmem [shape: f32[1,128], index: 1, kind: output, shape index: {}]  }
   0x1   :  { %v101_v0 = vld [vmem:[%s207_s0 + $0xf] sm:$0x1]   ;;  %v103_v1 = vld [vmem:[%s207_s0 + $0xd] sm:$0x1]   ;;  %v102_v2 = vld [vmem:[%s207_s0 + $0xe] sm:$0x1]  }
   0x2   :  { %7 = vrot.lane.b32.xlu0 %v101_v0, %s131_s10  ;;  %19 = vrot.lane.b32.xlu1 %v103_v1, %s132_s11  ;;  %v104_v3 = vld [vmem:[%s207_s0 + $0xc] sm:$0x1]   ;;  %s133_s16 = smov 112   ;;  %s134_s17 = smov 96   ;;  %v105_v4 = vld [vmem:[%s207_s0 + $0xb] sm:$0x1]  }
   0x3   :  { %v106_v5 = vld [vmem:[%s207_s0 + $0xa] sm:$0x1]   ;;  %v2_v6 = vld [vmem:[%s207_s0] sm:$0x1]   ;;  %s135_s24 = smov 88   ;;  %s136_s25 = smov 80  }
   0x4   :  { %4 = vst.msk [vmem:[#allocation0] sm:$0x1] %vm3_vm0, %v2_v6   ;;  %v107_v7 = vld [vmem:[%s207_s0 + $0x9] sm:$0x1]   ;;  %v108_v8 = vld [vmem:[%s207_s0 + $0x8] sm:$0x1]  }
   0x5   :  { %s137_s30 = smov 72   ;;  %s138_s2 = smov 64   ;;  %v109_v9 = vld [vmem:[%s207_s0 + $0x7] sm:$0x1]   ;;  %v110_v10 = vld [vmem:[%s207_s0 + $0x6] sm:$0x1]  }
   0x6   :  { %13 = vrot.lane.b32.xlu0 %v102_v2, %s133_s16  ;;  %25 = vrot.lane.b32.xlu1 %v104_v3, %s134_s17  ;;  %s139_s7 = smov 56   ;;  %s140_s8 = smov 48   ;;  %v111_v11 = vld [vmem:[%s207_s0 + $0x5] sm:$0x1]   ;;  %v112_v12 = vld [vmem:[%s207_s0 + $0x4] sm:$0x1]  }
   0x7   :  { %s141_s13 = smov 40   ;;  %s142_s14 = smov 32   ;;  %v113_v13 = vld [vmem:[%s207_s0 + $0x3] sm:$0x1]   ;;  %v114_v14 = vld [vmem:[%s207_s0 + $0x2] sm:$0x1]  }
   0x8   :  { %s143_s19 = smov 24   ;;  %s144_s20 = smov 16   ;;  %v115_v15 = vld [vmem:[%s207_s0 + $0x1] sm:$0x1]   ;;  %vm27_vm4 = vcmask 851712   ;;  %vm33_vm5 = vcmask 786112  }
   0x9   :  { %s145_s0 = smov 8   ;;  %vm39_vm6 = vcmask 720512   ;;  %vm45_vm7 = vcmask 654912   ;;  %vm51_vm8 = vcmask 589312   ;;  %vm57_vm9 = vcmask 523712  }
   0xa   :  { %31 = vrot.lane.b32.xlu0 %v105_v4, %s135_s24  ;;  %37 = vrot.lane.b32.xlu1 %v106_v5, %s136_s25  ;;  %vm63_vm10 = vcmask 458112   ;;  %vm69_vm11 = vcmask 392512   ;;  %vm75_vm12 = vcmask 326912   ;;  %vm81_vm13 = vcmask 261312  }
   0xb   :  { %vm87_vm14 = vcmask 195712   ;;  %vm93_vm15 = vcmask 130112  }
   0xe   :  { %43 = vrot.lane.b32.xlu0 %v107_v7, %s137_s30  ;;  %49 = vrot.lane.b32.xlu1 %v108_v8, %s138_s2 }
  0x12   :  { %55 = vrot.lane.b32.xlu0 %v109_v9, %s139_s7  ;;  %61 = vrot.lane.b32.xlu1 %v110_v10, %s140_s8 }
  0x16   :  { %67 = vrot.lane.b32.xlu0 %v111_v11, %s141_s13  ;;  %73 = vrot.lane.b32.xlu1 %v112_v12, %s142_s14 }
  0x1a   :  { %79 = vrot.lane.b32.xlu0 %v113_v13, %s143_s19  ;;  %85 = vrot.lane.b32.xlu1 %v114_v14, %s144_s20 }
  0x1e   :  { %91 = vrot.lane.b32.xlu0 %v115_v15, %s145_s0 }
  0x74   :  { %v8_v16 = vpop.permute.xlu0 %7   ;;  %v20_v17 = vpop.permute.xlu1 %19  }
  0x75   :  { %10 = vst.msk [vmem:[#allocation0] sm:$0x1] %vm9_vm1, %v8_v16  }
  0x78   :  { %v14_v18 = vpop.permute.xlu0 %13   ;;  %v26_v19 = vpop.permute.xlu1 %25  }
  0x79   :  { %16 = vst.msk [vmem:[#allocation0] sm:$0x1] %vm15_vm2, %v14_v18  }
  0x7a   :  { %22 = vst.msk [vmem:[#allocation0] sm:$0x1] %vm21_vm3, %v20_v17  }
  0x7b   :  { %28 = vst.msk [vmem:[#allocation0] sm:$0x1] %vm27_vm4, %v26_v19  }
  0x7c   :  { %v32_v20 = vpop.permute.xlu0 %31   ;;  %v38_v21 = vpop.permute.xlu1 %37  }
  0x7d   :  { %34 = vst.msk [vmem:[#allocation0] sm:$0x1] %vm33_vm5, %v32_v20  }
  0x7e   :  { %40 = vst.msk [vmem:[#allocation0] sm:$0x1] %vm39_vm6, %v38_v21  }
  0x80   :  { %v44_v22 = vpop.permute.xlu0 %43   ;;  %v50_v23 = vpop.permute.xlu1 %49  }
  0x81   :  { %46 = vst.msk [vmem:[#allocation0] sm:$0x1] %vm45_vm7, %v44_v22  }
  0x82   :  { %52 = vst.msk [vmem:[#allocation0] sm:$0x1] %vm51_vm8, %v50_v23  }
  0x84   :  { %v56_v24 = vpop.permute.xlu0 %55   ;;  %v62_v25 = vpop.permute.xlu1 %61  }
  0x85   :  { %58 = vst.msk [vmem:[#allocation0] sm:$0x1] %vm57_vm9, %v56_v24  }
  0x86   :  { %64 = vst.msk [vmem:[#allocation0] sm:$0x1] %vm63_vm10, %v62_v25  }
  0x88   :  { %v68_v26 = vpop.permute.xlu0 %67   ;;  %v74_v27 = vpop.permute.xlu1 %73  }
  0x89   :  { %70 = vst.msk [vmem:[#allocation0] sm:$0x1] %vm69_vm11, %v68_v26  }
  0x8a   :  { %76 = vst.msk [vmem:[#allocation0] sm:$0x1] %vm75_vm12, %v74_v27  }
  0x8c   :  { %v80_v28 = vpop.permute.xlu0 %79   ;;  %v86_v29 = vpop.permute.xlu1 %85  }
  0x8d   :  { %82 = vst.msk [vmem:[#allocation0] sm:$0x1] %vm81_vm13, %v80_v28  }
  0x8e   :  { %88 = vst.msk [vmem:[#allocation0] sm:$0x1] %vm87_vm14, %v86_v29  }
  0x90   :  { %v92_v30 = vpop.permute.xlu0 %91  }
  0x91   :  { %94 = vst.msk [vmem:[#allocation0] sm:$0x1] %vm93_vm15, %v92_v30  }
  0x98   :  { %v98_v31 = vld [vmem:[#allocation0] sm:$0x1] }
  0x99   :  { %100 = vst [vmem:[%s208_s1] sm:$0x1] %v98_v31 }

// kernel: gc_forward.1
= control target key start
LH: loop header
LB: loop body
LE: loop exit
PB: predicated region body
PF: predicated region fallthrough
CT: control target
= control target key end

     0   :  { %v726_v47 = vmov 1983009808   ;;  %v98_v49 = vlaneseq  ;;  %s1041_s0 = inlined_call_operand.vmem [shape: f32[2,576], index: 0, kind: input, shape index: {}]   ;;  %s1042_s1 = inlined_call_operand.vmem [shape: f32[576,128], index: 1, kind: input, shape index: {}]   ;;  %s1043_s2 = inlined_call_operand.vmem [shape: f32[128,128], index: 2, kind: input, shape index: {}]   ;;  %s1044_s3 = inlined_call_operand.vmem [shape: f32[1,128], index: 3, kind: input, shape index: {}]   ;;  %s1045_s4 = inlined_call_operand.hbm [shape: f32[2,128], index: 4, kind: output, shape index: {}]  }
   0x1   :  { %v36_v0 = vld [vmem:[%s1042_s1 + $0x80] sm:$0xff]  ;;  %v37_v1 = vld [vmem:[%s1042_s1 + $0x88] sm:$0xff]  ;;  %v38_v11 = vld [vmem:[%s1042_s1 + $0x90] sm:$0xff]  ;;  %v96_v48 = vunpack.c.l.s4 %v726_v47 }
   0x2   :  { %v68_v2 = vld [vmem:[%s1042_s1 + $0x180] sm:$0xff]  ;;  %v596_v3 = vpack.c.bf16 %v37_v1, %v36_v0  ;;  %v69_v4 = vld [vmem:[%s1042_s1 + $0x188] sm:$0xff]  ;;  %v39_v13 = vld [vmem:[%s1042_s1 + $0x98] sm:$0xff]  ;;  %v99_v0 = vshrl.u32 %v98_v49, 7 }
   0x3   :  { %v20_v5 = vld [vmem:[%s1042_s1] sm:$0xff]  ;;  %v21_v6 = vld [vmem:[%s1042_s1 + $0x8] sm:$0xff]  ;;  %v628_v7 = vpack.c.bf16 %v69_v4, %v68_v2  ;;  %v70_v14 = vld [vmem:[%s1042_s1 + $0x190] sm:$0xff]  ;;  %v600_v16 = vpack.c.bf16 %v39_v13, %v38_v11  ;;  %v97_v63 = vunpack.c.0.s8 %v96_v48 }
   0x4   :  { %v598_v8 = vpack.c.bf16 %v21_v6, %v20_v5  ;;  %v52_v9 = vld [vmem:[%s1042_s1 + $0x100] sm:$0xff]  ;;  %v53_v10 = vld [vmem:[%s1042_s1 + $0x108] sm:$0xff]  ;;  %597 = vmatprep.subr.bf16.mxu0 %v596_v3  ;;  %v71_v15 = vld [vmem:[%s1042_s1 + $0x198] sm:$0xff] }
   0x5   :  { %v630_v12 = vpack.c.bf16 %v53_v10, %v52_v9  ;;  %629 = vmatprep.subr.bf16.mxu1 %v628_v7  ;;  %v632_v17 = vpack.c.bf16 %v71_v15, %v70_v14  ;;  %v22_v18 = vld [vmem:[%s1042_s1 + $0x10] sm:$0xff]  ;;  %v23_v19 = vld [vmem:[%s1042_s1 + $0x18] sm:$0xff]  ;;  %v40_v23 = vld [vmem:[%s1042_s1 + $0xa0] sm:$0xff]  ;;  %v100_v13 = vsub.s32 %v97_v63, %v99_v0 }
   0x6   :  { %599 = vmatpush3.bf16.msra.mxu0 %v598_v8  ;;  %v54_v20 = vld [vmem:[%s1042_s1 + $0x110] sm:$0xff]  ;;  %v602_v21 = vpack.c.bf16 %v23_v19, %v22_v18  ;;  %v55_v22 = vld [vmem:[%s1042_s1 + $0x118] sm:$0xff]  ;;  %v41_v24 = vld [vmem:[%s1042_s1 + $0xa8] sm:$0xff] }
   0x7   :  { %631 = vmatpush3.bf16.msra.mxu1 %v630_v12  ;;  %601 = vmatprep.subr.bf16.mxu0 %v600_v16  ;;  %v634_v25 = vpack.c.bf16 %v55_v22, %v54_v20  ;;  %v604_v26 = vpack.c.bf16 %v41_v24, %v40_v23  ;;  %v72_v27 = vld [vmem:[%s1042_s1 + $0x1a0] sm:$0xff]  ;;  %v73_v28 = vld [vmem:[%s1042_s1 + $0x1a8] sm:$0xff]  ;;  %v42_v35 = vld [vmem:[%s1042_s1 + $0xb0] sm:$0xff] }
   0x8   :  { %633 = vmatprep.subr.bf16.mxu1 %v632_v17  ;;  %v24_v29 = vld [vmem:[%s1042_s1 + $0x20] sm:$0xff]  ;;  %v636_v30 = vpack.c.bf16 %v73_v28, %v72_v27  ;;  %v25_v31 = vld [vmem:[%s1042_s1 + $0x28] sm:$0xff]  ;;  %v43_v36 = vld [vmem:[%s1042_s1 + $0xb8] sm:$0xff] }
   0x9   :  { %v56_v32 = vld [vmem:[%s1042_s1 + $0x120] sm:$0xff]  ;;  %v57_v33 = vld [vmem:[%s1042_s1 + $0x128] sm:$0xff]  ;;  %v606_v34 = vpack.c.bf16 %v25_v31, %v24_v29  ;;  %v74_v37 = vld [vmem:[%s1042_s1 + $0x1b0] sm:$0xff]  ;;  %v608_v39 = vpack.c.bf16 %v43_v36, %v42_v35 }
   0xa   :  { %603 = vmatpush3.bf16.msra.mxu0 %v602_v21  ;;  %v638_v38 = vpack.c.bf16 %v57_v33, %v56_v32  ;;  %v75_v40 = vld [vmem:[%s1042_s1 + $0x1b8] sm:$0xff]  ;;  %v26_v41 = vld [vmem:[%s1042_s1 + $0x30] sm:$0xff]  ;;  %v44_v46 = vld [vmem:[%s1042_s1 + $0xc0] sm:$0xff] }
   0xb   :  { %635 = vmatpush3.bf16.msra.mxu1 %v634_v25  ;;  %605 = vmatprep.subr.bf16.mxu0 %v604_v26  ;;  %v27_v42 = vld [vmem:[%s1042_s1 + $0x38] sm:$0xff]  ;;  %v640_v43 = vpack.c.bf16 %v75_v40, %v74_v37  ;;  %v58_v44 = vld [vmem:[%s1042_s1 + $0x130] sm:$0xff]  ;;  %v45_v50 = vld [vmem:[%s1042_s1 + $0xc8] sm:$0xff] }
   0xc   :  { %637 = vmatprep.subr.bf16.mxu1 %v636_v30  ;;  %v59_v45 = vld [vmem:[%s1042_s1 + $0x138] sm:$0xff]  ;;  %v76_v51 = vld [vmem:[%s1042_s1 + $0x1c0] sm:$0xff]  ;;  %v77_v52 = vld [vmem:[%s1042_s1 + $0x1c8] sm:$0xff]  ;;  %v610_v53 = vpack.c.bf16 %v27_v42, %v26_v41  ;;  %v612_v55 = vpack.c.bf16 %v45_v50, %v44_v46 }
   0xd   :  { %v642_v54 = vpack.c.bf16 %v59_v45, %v58_v44  ;;  %v28_v56 = vld [vmem:[%s1042_s1 + $0x40] sm:$0xff]  ;;  %v29_v57 = vld [vmem:[%s1042_s1 + $0x48] sm:$0xff]  ;;  %v644_v59 = vpack.c.bf16 %v77_v52, %v76_v51  ;;  %v46_v61 = vld [vmem:[%s1042_s1 + $0xd0] sm:$0xff] }
   0xe   :  { %607 = vmatpush3.bf16.msra.mxu0 %v606_v34  ;;  %v60_v58 = vld [vmem:[%s1042_s1 + $0x140] sm:$0xff]  ;;  %v61_v60 = vld [vmem:[%s1042_s1 + $0x148] sm:$0xff]  ;;  %v47_v62 = vld [vmem:[%s1042_s1 + $0xd8] sm:$0xff]  ;;  %v614_v3 = vpack.c.bf16 %v29_v57, %v28_v56 }
   0xf   :  { %639 = vmatpush3.bf16.msra.mxu1 %v638_v38  ;;  %609 = vmatprep.subr.bf16.mxu0 %v608_v39  ;;  %v78_v1 = vld [vmem:[%s1042_s1 + $0x1d0] sm:$0xff]  ;;  %v79_v2 = vld [vmem:[%s1042_s1 + $0x1d8] sm:$0xff]  ;;  %v646_v4 = vpack.c.bf16 %v61_v60, %v60_v58  ;;  %v616_v5 = vpack.c.bf16 %v47_v62, %v46_v61  ;;  %v48_v11 = vld [vmem:[%s1042_s1 + $0xe0] sm:$0xff] }
  0x10   :  { %641 = vmatprep.subr.bf16.mxu1 %v640_v43  ;;  %v30_v6 = vld [vmem:[%s1042_s1 + $0x50] sm:$0xff]  ;;  %v31_v7 = vld [vmem:[%s1042_s1 + $0x58] sm:$0xff]  ;;  %v648_v9 = vpack.c.bf16 %v79_v2, %v78_v1  ;;  %v49_v12 = vld [vmem:[%s1042_s1 + $0xe8] sm:$0xff] }
  0x11   :  { %v62_v8 = vld [vmem:[%s1042_s1 + $0x150] sm:$0xff]  ;;  %v63_v10 = vld [vmem:[%s1042_s1 + $0x158] sm:$0xff]  ;;  %v80_v14 = vld [vmem:[%s1042_s1 + $0x1e0] sm:$0xff]  ;;  %v618_v16 = vpack.c.bf16 %v31_v7, %v30_v6  ;;  %v620_v19 = vpack.c.bf16 %v49_v12, %v48_v11 }
  0x12   :  { %611 = vmatpush3.bf16.msra.mxu0 %v610_v53  ;;  %v81_v15 = vld [vmem:[%s1042_s1 + $0x1e8] sm:$0xff]  ;;  %v32_v17 = vld [vmem:[%s1042_s1 + $0x60] sm:$0xff]  ;;  %v650_v18 = vpack.c.bf16 %v63_v10, %v62_v8  ;;  %v50_v25 = vld [vmem:[%s1042_s1 + $0xf0] sm:$0xff] }
  0x13   :  { %643 = vmatpush3.bf16.msra.mxu1 %v642_v54  ;;  %613 = vmatprep.subr.bf16.mxu0 %v612_v55  ;;  %v33_v20 = vld [vmem:[%s1042_s1 + $0x68] sm:$0xff]  ;;  %v64_v21 = vld [vmem:[%s1042_s1 + $0x160] sm:$0xff]  ;;  %v652_v23 = vpack.c.bf16 %v81_v15, %v80_v14  ;;  %v51_v26 = vld [vmem:[%s1042_s1 + $0xf8] sm:$0xff] }
  0x14   :  { %645 = vmatprep.subr.bf16.mxu1 %v644_v59  ;;  %v18_v22 = vld [vmem:[%s1041_s0] sm:$0xff]  ;;  %v65_v24 = vld [vmem:[%s1042_s1 + $0x168] sm:$0xff]  ;;  %v82_v29 = vld [vmem:[%s1042_s1 + $0x1f0] sm:$0xff]  ;;  %v622_v31 = vpack.c.bf16 %v33_v20, %v32_v17  ;;  %v624_v35 = vpack.c.bf16 %v51_v26, %v50_v25 }
  0x15   :  { %v101_v27 = vrot.slane %v18_v22, %v100_v13  ;;  %v94_v28 = vcombine.high %v18_v22, %v18_v22  ;;  %v83_v30 = vld [vmem:[%s1042_s1 + $0x1f8] sm:$0xff]  ;;  %v654_v34 = vpack.c.bf16 %v65_v24, %v64_v21  ;;  %v34_v36 = vld [vmem:[%s1042_s1 + $0x70] sm:$0xff] }
  0x16   :  { %615 = vmatpush3.bf16.msra.mxu0 %v614_v3  ;;  %v35_v37 = vld [vmem:[%s1042_s1 + $0x78] sm:$0xff]  ;;  %v656_v38 = vpack.c.bf16 %v83_v30, %v82_v29  ;;  %v66_v39 = vld [vmem:[%s1042_s1 + $0x170] sm:$0xff] }
  0x17   :  { %647 = vmatpush3.bf16.msra.mxu1 %v646_v4  ;;  %617 = vmatprep.subr.bf16.mxu0 %v616_v5  ;;  %v109_v32 = vcombine.high %v101_v27, %v101_v27  ;;  %v108_v33 = vrot.slane %v94_v28, %v100_v13  ;;  %v67_v40 = vld [vmem:[%s1042_s1 + $0x178] sm:$0xff] }
  0x18   :  { %649 = vmatprep.subr.bf16.mxu1 %v648_v9 }
  0x19   :  { %189 = vmatprep.mubr.f32.mxu0 %v109_v32  ;;  %v110_v41 = vcombine.high %v108_v33, %v108_v33 }
  0x1a   :  { %619 = vmatpush3.bf16.msra.mxu0 %v618_v16 }
  0x1b   :  { %651 = vmatpush3.bf16.msra.mxu1 %v650_v18  ;;  %621 = vmatprep.subr.bf16.mxu0 %v620_v19 }
  0x1c   :  { %653 = vmatprep.subr.bf16.mxu1 %v652_v23 }
  0x1d   :  { %9 = vsyncpa [#allocation3], 0  ;;  %v626_v42 = vpack.c.bf16 %v35_v37, %v34_v36  ;;  %259 = vmatprep.mubr.f32.mxu1 %v110_v41  ;;  %v658_v43 = vpack.c.bf16 %v67_v40, %v66_v39  ;;  %v84_v44 = vld [vmem:[%s1042_s1 + $0x200] sm:$0xff]  ;;  %v85_v45 = vld [vmem:[%s1042_s1 + $0x208] sm:$0xff]  ;;  %v727_v49 = vmov 0.0|0.0   ;;  %vm728_vm0 = vmmov 0  }
  0x1e   :  { %623 = vmatpush3.bf16.msra.mxu0 %v622_v31  ;;  %v335_v46 = vld [vmem:[%s1043_s2] sm:$0xff]  ;;  %v336_v47 = vld [vmem:[%s1043_s2 + $0x8] sm:$0xff]  ;;  %v661_v48 = vpack.c.bf16 %v85_v45, %v84_v44  ;;  %v86_v50 = vld [vmem:[%s1042_s1 + $0x210] sm:$0xff]  ;;  %v729_v58 = vmov 0.0   ;;  %vm122_vm1 = vcmask 523264   ;;  %s730_s13 = smov [#allocation2]  }
  0x1f   :  { %655 = vmatpush3.bf16.msra.mxu1 %v654_v34  ;;  %625 = vmatprep.subr.bf16.mxu0 %v624_v35  ;;  %v87_v51 = vld [vmem:[%s1042_s1 + $0x218] sm:$0xff]  ;;  %v673_v52 = vpack.c.bf16 %v336_v47, %v335_v46  ;;  %v337_v53 = vld [vmem:[%s1043_s2 + $0x10] sm:$0xff]  ;;  %v88_v56 = vld [vmem:[%s1042_s1 + $0x220] sm:$0xff]  ;;  %s435_s14 = sshll.u32 %s730_s13, 4  ;;  %s436_s14 = int_to_ptr.vmem [resolvable:$true] %s435_s14 }
  0x20   :  { %657 = vmatprep.subr.bf16.mxu1 %v656_v38  ;;  %v338_v54 = vld [vmem:[%s1043_s2 + $0x18] sm:$0xff]  ;;  %v664_v55 = vpack.c.bf16 %v87_v51, %v86_v50  ;;  %v89_v57 = vld [vmem:[%s1042_s1 + $0x228] sm:$0xff]  ;;  %v339_v60 = vld [vmem:[%s1043_s2 + $0x20] sm:$0xff]  ;;  %p707_p1 = scmp.lt.s32.totalorder %s436_s14, %s436_s14 }
  0x21   :  { %v676_v59 = vpack.c.bf16 %v338_v54, %v337_v53  ;;  %v340_v61 = vld [vmem:[%s1043_s2 + $0x28] sm:$0xff]  ;;  %v667_v62 = vpack.c.bf16 %v89_v57, %v88_v56  ;;  %v90_v63 = vld [vmem:[%s1042_s1 + $0x230] sm:$0xff]  ;;  %v91_v0 = vld [vmem:[%s1042_s1 + $0x238] sm:$0xff] }
  0x22   :  { %627 = vmatpush3.bf16.msra.mxu0 %v626_v42  ;;  %v679_v1 = vpack.c.bf16 %v340_v61, %v339_v60  ;;  %v670_v2 = vpack.c.bf16 %v91_v0, %v90_v63  ;;  %v443_v3 = vld.sshfl [vmem:[%s1041_s0 + $0x8] sm:$0x3 pattern:$0x76325410]  ;;  %v341_v4 = vld [vmem:[%s1043_s2 + $0x30] sm:$0xff]  ;;  %v342_v5 = vld [vmem:[%s1043_s2 + $0x38] sm:$0xff] }
  0x23   :  { %659 = vmatpush3.bf16.msra.mxu1 %v658_v43  ;;  %660 = vmatprep.subr.bf16.mxu0 %v727_v49  ;;  %v682_v6 = vpack.c.bf16 %v342_v5, %v341_v4  ;;  %v343_v7 = vld [vmem:[%s1043_s2 + $0x40] sm:$0xff]  ;;  %v344_v8 = vld [vmem:[%s1043_s2 + $0x48] sm:$0xff]  ;;  %v345_v10 = vld [vmem:[%s1043_s2 + $0x50] sm:$0xff] }
  0x24   :  { %672 = vmatprep.subr.bf16.mxu1 %v727_v49  ;;  %v685_v9 = vpack.c.bf16 %v344_v8, %v343_v7  ;;  %v346_v11 = vld [vmem:[%s1043_s2 + $0x58] sm:$0xff]  ;;  %v347_v13 = vld [vmem:[%s1043_s2 + $0x60] sm:$0xff]  ;;  %v348_v14 = vld [vmem:[%s1043_s2 + $0x68] sm:$0xff] }
  0x25   :  { %190 = vmatmul.mubr.f32.vlgmr.msra.gmra.mrb[0].mxu0 %v101_v27  ;;  %v688_v12 = vpack.c.bf16 %v346_v11, %v345_v10  ;;  %v691_v15 = vpack.c.bf16 %v348_v14, %v347_v13  ;;  %v349_v16 = vld [vmem:[%s1043_s2 + $0x70] sm:$0xff]  ;;  %v350_v17 = vld [vmem:[%s1043_s2 + $0x78] sm:$0xff]  ;;  %v445_v29 = vld [vmem:[%s1044_s3] ss:$0 sm:$0xff]  ;;  %s702_s2 = scalar_lea.vmem %s436_s14, 32 }
  0x26   :  { %260 = vmatmul.mubr.f32.vlgmr.msra.gmra.mrb[0].mxu1 %v108_v33  ;;  %662 = vmatpush3.bf16.msra.mxu0 %v661_v48  ;;  %v694_v18 = vpack.c.bf16 %v350_v17, %v349_v16  ;;  %p703_p0 = scmp.ne.s32.totalorder %s436_s14, %s702_s2  ;;  %p708_p2 = scmp.lt.s32.totalorder %s702_s2, %s702_s2 }
  0x27   :  { %663 = vmatprep.subr.bf16.mxu0 %v727_v49  ;;  %558 = vmatprep.mubr.msk.f32.mxu0 %vm728_vm0, %v729_v58 }
  0x28   :  { %674 = vmatpush3.bf16.msra.mxu1 %v673_v52  ;;  %593 = vmatprep.mubr.msk.f32.mxu1 %vm728_vm0, %v729_v58  ;;  %p709_p3 = por %p708_p2, %p707_p1 }
  0x29   :  { %675 = vmatprep.subr.bf16.mxu1 %v727_v49 }
  0x2a   :  { %665 = vmatpush3.bf16.msra.mxu0 %v664_v55  ;;  %p710_p4 = pnand %p709_p3, %p703_p0 }
  0x2b   :  { %666 = vmatprep.subr.bf16.mxu0 %v727_v49 }
  0x2c   :  { %677 = vmatpush3.bf16.msra.mxu1 %v676_v59 }
  0x2d   :  { %678 = vmatprep.subr.bf16.mxu1 %v727_v49 }
  0x2e   :  { %668 = vmatpush3.bf16.msra.mxu0 %v667_v62 }
  0x2f   :  { %669 = vmatprep.subr.bf16.mxu0 %v727_v49 }
  0x30   :  { %680 = vmatpush3.bf16.msra.mxu1 %v679_v1 }
  0x31   :  { %681 = vmatprep.subr.bf16.mxu1 %v727_v49 }
  0x32   :  { %671 = vmatpush3.bf16.msra.mxu0 %v670_v2 }
  0x34   :  { %683 = vmatpush3.bf16.msra.mxu1 %v682_v6 }
  0x35   :  { %559 = vmatmul.mubr.msk.f32.vlgmr.msra.gmra.mrb[2].mxu0 %vm122_vm1, %v443_v3  ;;  %684 = vmatprep.subr.bf16.mxu1 %v727_v49 }
  0x38   :  { %686 = vmatpush3.bf16.msra.mxu1 %v685_v9 }
  0x39   :  { %687 = vmatprep.subr.bf16.mxu1 %v727_v49 }
  0x3c   :  { %689 = vmatpush3.bf16.msra.mxu1 %v688_v12 }
  0x3d   :  { %690 = vmatprep.subr.bf16.mxu1 %v727_v49 }
  0x40   :  { %692 = vmatpush3.bf16.msra.mxu1 %v691_v15 }
  0x41   :  { %693 = vmatprep.subr.bf16.mxu1 %v727_v49 }
  0x44   :  { %695 = vmatpush3.bf16.msra.mxu1 %v694_v18 }
  0xf8   :  { %v478_v19 = vpop.f32.mrb[0].mxu0 }
  0xf9   :  { %v513_v20 = vpop.f32.mrb[0].mxu1  ;;  %v479_v21 = vpop.f32.mrb[1].mxu0 }
  0xfa   :  { %v480_v22 = vadd.f32 %v479_v21, %v478_v19  ;;  %v514_v23 = vpop.f32.mrb[1].mxu1 }
  0xfb   :  { %v515_v24 = vadd.f32 %v514_v23, %v513_v20 }
  0xfd   :  { %v262_v25 = vadd.f32 %v515_v24, %v480_v22 }
 0x108   :  { %v331_v26 = vpop.f32.mrb[2].mxu0 }
 0x109   :  { %v332_v27 = vadd.f32 %v331_v26, %v262_v25  ;;  %v560_v28 = vpop.f32.mrb[3].mxu0 }
 0x10b   :  { %594 = vmatmul.mubr.f32.vlgmr.msra.gmra.mrb[2].mxu1 %v332_v27 }
 0x1de   :  { %v424_v30 = vpop.f32.mrb[2].mxu1 }
 0x1df   :  { %v425_v31 = vadd.f32 %v445_v29, %v424_v30  ;;  %v595_v32 = vpop.f32.mrb[3].mxu1 }
 0x1e1   :  { %428 = vst [vmem:[#allocation2] sm:$0x3] %v425_v31 }
 0x1e2   :  { %713 = shalt.err (!%p710_p4)
}
 0x1e3   :  { %s714_s17 = scalar_lea.hbm %s1045_s4, 32 }
 0x1e4   :  { %p715_p5 = scmp.ne.s32.totalorder %s1045_s4, %s714_s17  ;;  %p718_p6 = scmp.lt.u32.totalorder %s714_s17, %s1045_s4 }
 0x1e6   :  { %p720_p7 = pnand %p718_p6, %p715_p5 }
 0x1e8   :  { %723 = shalt.err (!%p720_p7)
}
 0x1e9   :  { %438 = dma.vmem_to_hbm [thread:$0]  %s436_s14, 32, %s1045_s4, [#allocation3]  }
 0x1ea   :  { %724 = dma.done.wait [#allocation3], 32  }
 0x1eb   :  { %725 = vsyncadd [#allocation3], 4294967264 }
 0x1ec   :  { %442 = vsyncpa [#allocation3], 1 }

</bundles_post_ra>
